<compile_context>
chip_gen: v6e
topology: v6e:2x2x1
jax: 0.10.0
libtpu: 0.0.40
codegen_flags: <defaults>
</compile_context>

<pallas_src>
import jax
import jax.numpy as jnp
from jax.experimental import pallas as pl
from jax.experimental.pallas import tpu as pltpu

INPUT_DIM = 784
HIDDEN_DIM = 400          # logical hidden size (matches the PyTorch module)
HIDDEN_PAD = 512          # padded to 4 full 128-lane vregs
LATENT_DIM = 32
OUT_PAD = 128             # fused [mu | logvar | zero-pad] -> one lane-dense output
BN_EPS = 1e-5


def encoder_kernel(x_ref, w1_ref, gb_ref, wf_ref, bf_ref, out_ref):
    # fc1: cast x f32 -> bf16 in-kernel, bf16 x bf16 MXU matmul, f32 accumulate.
    # fc1 bias is intentionally omitted: training-mode BN subtracts the batch
    # mean, so a per-feature constant bias cancels exactly (centered/var unchanged).
    x = x_ref[...].astype(jnp.bfloat16)
    h = jnp.dot(x, w1_ref[...], preferred_element_type=jnp.float32)

    # BatchNorm1d (training mode): per-feature batch mean / biased variance.
    # The entire batch is resident in this single block, so stats are exact.
    mean = jnp.mean(h, axis=0, keepdims=True)
    centered = h - mean
    var = jnp.mean(centered * centered, axis=0, keepdims=True)
    gamma = gb_ref[0:1, :]
    beta = gb_ref[1:2, :]
    h = centered * jax.lax.rsqrt(var + BN_EPS) * gamma + beta

    # ReLU, then back to bf16 for the second MXU matmul.
    h = jnp.maximum(h, 0.0).astype(jnp.bfloat16)

    # Fused fc_mu | fc_logvar: one (B, 512) @ (512, 128) matmul, lane-dense store.
    out_ref[...] = (jnp.dot(h, wf_ref[...], preferred_element_type=jnp.float32)
                    + bf_ref[...])


@jax.jit
def encoder_forward(x, params):
    B = x.shape[0]

    cost = pl.CostEstimate(
        flops=2 * B * (INPUT_DIM * HIDDEN_PAD + HIDDEN_PAD * OUT_PAD),
        transcendentals=HIDDEN_PAD,                      # rsqrt per feature
        bytes_accessed=(x.size * 4
                        + params["w1"].size * 2
                        + params["w_fused"].size * 2
                        + params["gamma_beta"].size * 4
                        + params["b_fused"].size * 4
                        + B * OUT_PAD * 4),
    )

    out = pl.pallas_call(
        encoder_kernel,
        out_shape=jax.ShapeDtypeStruct((B, OUT_PAD), jnp.float32),
        grid=(1,),  # single step: everything (<1.2 MB) resident in VMEM
        in_specs=[
            pl.BlockSpec((B, INPUT_DIM), lambda i: (0, 0)),        # x (f32)
            pl.BlockSpec((INPUT_DIM, HIDDEN_PAD), lambda i: (0, 0)),  # w1 (bf16)
            pl.BlockSpec((2, HIDDEN_PAD), lambda i: (0, 0)),       # [gamma; beta]
            pl.BlockSpec((HIDDEN_PAD, OUT_PAD), lambda i: (0, 0)),  # fused W (bf16)
            pl.BlockSpec((1, OUT_PAD), lambda i: (0, 0)),          # fused bias
        ],
        out_specs=pl.BlockSpec((B, OUT_PAD), lambda i: (0, 0)),
        compiler_params=pltpu.CompilerParams(
            dimension_semantics=("arbitrary",)),
        cost_estimate=cost,
    )(x,
      params["w1"],
      params["gamma_beta"],
      params["w_fused"],
      params["b_fused"])

    mu = out[:, :LATENT_DIM]
    logvar = out[:, LATENT_DIM:2 * LATENT_DIM]
    return mu, logvar


def init_params(key):
    """Deterministic init mimicking nn.Linear default (uniform +/- 1/sqrt(fan_in)),
    stored pre-transposed (in, out), hidden padded to 512, mu/logvar fused.
    The fc1 bias is not materialized: it is mathematically dead under
    training-mode BatchNorm (mean subtraction cancels it)."""
    keys = jax.random.split(key, 6)

    def linear(kw, kb, fan_in, fan_out):
        bound = 1.0 / (fan_in ** 0.5)
        w = jax.random.uniform(kw, (fan_in, fan_out), jnp.float32, -bound, bound)
        b = jax.random.uniform(kb, (1, fan_out), jnp.float32, -bound, bound)
        return w, b

    w1, _b1_unused = linear(keys[0], keys[1], INPUT_DIM, HIDDEN_DIM)
    w_mu, b_mu = linear(keys[2], keys[3], HIDDEN_DIM, LATENT_DIM)
    w_lv, b_lv = linear(keys[4], keys[5], HIDDEN_DIM, LATENT_DIM)

    # Pad hidden 400 -> 512; padded columns stay exactly zero through BN/ReLU
    # (zero w1 cols, gamma irrelevant since centered=0, beta padding must be 0).
    w1_p = jnp.zeros((INPUT_DIM, HIDDEN_PAD), jnp.float32).at[:, :HIDDEN_DIM].set(w1)
    gamma = jnp.ones((1, HIDDEN_PAD), jnp.float32)      # BatchNorm1d weight init
    beta = jnp.zeros((1, HIDDEN_PAD), jnp.float32)      # BatchNorm1d bias init
    gamma_beta = jnp.concatenate([gamma, beta], axis=0)  # (2, HIDDEN_PAD), one DMA

    # Fuse fc_mu / fc_logvar into one lane-dense (512, 128) weight + (1, 128) bias.
    w_f = jnp.zeros((HIDDEN_PAD, OUT_PAD), jnp.float32)
    w_f = w_f.at[:HIDDEN_DIM, :LATENT_DIM].set(w_mu)
    w_f = w_f.at[:HIDDEN_DIM, LATENT_DIM:2 * LATENT_DIM].set(w_lv)
    b_f = jnp.zeros((1, OUT_PAD), jnp.float32)
    b_f = b_f.at[:, :LATENT_DIM].set(b_mu)
    b_f = b_f.at[:, LATENT_DIM:2 * LATENT_DIM].set(b_lv)

    return {
        "w1": w1_p.astype(jnp.bfloat16),        # bf16 weights: halve dominant DMA
        "gamma_beta": gamma_beta,
        "w_fused": w_f.astype(jnp.bfloat16),
        "b_fused": b_f,
    }


def encoder_reference(x, p):
    """Pure-JAX reference mirroring the kernel's bf16 operand rounding."""
    x32 = x.astype(jnp.bfloat16).astype(jnp.float32)
    w1 = p["w1"].astype(jnp.float32)
    h = x32 @ w1                                  # fc1 bias cancels under BN
    mean = jnp.mean(h, axis=0, keepdims=True)
    centered = h - mean
    var = jnp.mean(centered * centered, axis=0, keepdims=True)
    gamma = p["gamma_beta"][0:1, :]
    beta = p["gamma_beta"][1:2, :]
    h = centered * jax.lax.rsqrt(var + BN_EPS) * gamma + beta
    h = jnp.maximum(h, 0.0).astype(jnp.bfloat16).astype(jnp.float32)
    out = h @ p["w_fused"].astype(jnp.float32) + p["b_fused"]
    return out[:, :LATENT_DIM], out[:, LATENT_DIM:2 * LATENT_DIM]


if __name__ == "__main__":
    key = jax.random.PRNGKey(0)
    k_params, k_x = jax.random.split(key)

    params = init_params(k_params)
    batch = 8
    x = jax.random.normal(k_x, (batch, INPUT_DIM), jnp.float32)

    mu, logvar = encoder_forward(x, params)
    jax.block_until_ready((mu, logvar))

    mu_ref, logvar_ref = encoder_reference(x, params)
    assert mu.shape == (batch, LATENT_DIM) and logvar.shape == (batch, LATENT_DIM)
    assert jnp.allclose(mu, mu_ref, atol=5e-3, rtol=5e-3), \
        float(jnp.max(jnp.abs(mu - mu_ref)))
    assert jnp.allclose(logvar, logvar_ref, atol=5e-3, rtol=5e-3), \
        float(jnp.max(jnp.abs(logvar - logvar_ref)))

    print("KERNEL_OK")
</pallas_src>

<mosaic_0001>
module attributes {stable_mosaic.version = 11 : i64} {
  func.func @encoder_kernel(%arg0: i32, %arg1: memref<8x784xf32, #tpu.memory_space<vmem>>, %arg2: memref<784x512xbf16, #tpu.memory_space<vmem>>, %arg3: memref<2x512xf32, #tpu.memory_space<vmem>>, %arg4: memref<512x128xbf16, #tpu.memory_space<vmem>>, %arg5: memref<1x128xf32, #tpu.memory_space<vmem>>, %arg6: memref<8x128xf32, #tpu.memory_space<vmem>>) attributes {dimension_semantics = [#tpu.dimension_semantics<arbitrary>], iteration_bounds = array<i64: 1>, scalar_prefetch = 0 : i64, scratch_operands = 0 : i64, tpu.core_type = #tpu.core_type<tc>, window_params = [{pipeline_mode = #tpu.pipeline_mode<synchronous>, transform_indices = @transform_0, window_bounds = array<i64: 8, 784>}, {pipeline_mode = #tpu.pipeline_mode<synchronous>, transform_indices = @transform_1, window_bounds = array<i64: 784, 512>}, {pipeline_mode = #tpu.pipeline_mode<synchronous>, transform_indices = @transform_2, window_bounds = array<i64: 2, 512>}, {pipeline_mode = #tpu.pipeline_mode<synchronous>, transform_indices = @transform_3, window_bounds = array<i64: 512, 128>}, {pipeline_mode = #tpu.pipeline_mode<synchronous>, transform_indices = @transform_4, window_bounds = array<i64: 1, 128>}, {pipeline_mode = #tpu.pipeline_mode<synchronous>, transform_indices = @transform_5, window_bounds = array<i64: 8, 128>}]} {
    %c0 = arith.constant 0 : index
    %c0_0 = arith.constant 0 : index
    %0 = vector.load %arg1[%c0, %c0_0] : memref<8x784xf32, #tpu.memory_space<vmem>>, vector<8x784xf32>
    %1 = arith.truncf %0 : vector<8x784xf32> to vector<8x784xbf16>
    %c0_1 = arith.constant 0 : index
    %c0_2 = arith.constant 0 : index
    %2 = vector.load %arg2[%c0_1, %c0_2] : memref<784x512xbf16, #tpu.memory_space<vmem>>, vector<784x512xbf16>
    %cst = arith.constant dense<0.000000e+00> : vector<8x512xf32>
    %3 = tpu.matmul %1, %2, %cst {dimension_numbers = #tpu.dot_dimension_numbers<[1], [0], [0], [1], [0, 0, 1, 1], [], []>} : vector<8x784xbf16>, vector<784x512xbf16>, vector<8x512xf32> -> vector<8x512xf32>
    %cst_3 = arith.constant dense<0.000000e+00> : vector<512xf32>
    %4 = vector.multi_reduction <add>, %3, %cst_3 [0] : vector<8x512xf32> to vector<512xf32>
    %5 = vector.shape_cast %4 : vector<512xf32> to vector<1x512xf32>
    %cst_4 = arith.constant 8.000000e+00 : f32
    %6 = vector.broadcast %cst_4 : f32 to vector<1x512xf32>
    %7 = arith.divf %5, %6 : vector<1x512xf32>
    %8 = vector.broadcast %7 : vector<1x512xf32> to vector<8x512xf32>
    %9 = arith.subf %3, %8 : vector<8x512xf32>
    %10 = arith.mulf %9, %9 : vector<8x512xf32>
    %cst_5 = arith.constant dense<0.000000e+00> : vector<512xf32>
    %11 = vector.multi_reduction <add>, %10, %cst_5 [0] : vector<8x512xf32> to vector<512xf32>
    %12 = vector.shape_cast %11 : vector<512xf32> to vector<1x512xf32>
    %cst_6 = arith.constant 8.000000e+00 : f32
    %13 = vector.broadcast %cst_6 : f32 to vector<1x512xf32>
    %14 = arith.divf %12, %13 : vector<1x512xf32>
    %c0_7 = arith.constant 0 : index
    %c0_8 = arith.constant 0 : index
    %15 = vector.load %arg3[%c0_7, %c0_8] : memref<2x512xf32, #tpu.memory_space<vmem>>, vector<1x512xf32>
    %c1 = arith.constant 1 : index
    %c0_9 = arith.constant 0 : index
    %16 = vector.load %arg3[%c1, %c0_9] : memref<2x512xf32, #tpu.memory_space<vmem>>, vector<1x512xf32>
    %cst_10 = arith.constant 9.99999974E-6 : f32
    %17 = vector.broadcast %cst_10 : f32 to vector<1x512xf32>
    %18 = arith.addf %14, %17 : vector<1x512xf32>
    %19 = math.rsqrt %18 : vector<1x512xf32>
    %20 = vector.broadcast %19 : vector<1x512xf32> to vector<8x512xf32>
    %21 = arith.mulf %9, %20 : vector<8x512xf32>
    %22 = vector.broadcast %15 : vector<1x512xf32> to vector<8x512xf32>
    %23 = arith.mulf %21, %22 : vector<8x512xf32>
    %24 = vector.broadcast %16 : vector<1x512xf32> to vector<8x512xf32>
    %25 = arith.addf %23, %24 : vector<8x512xf32>
    %cst_11 = arith.constant 0.000000e+00 : f32
    %26 = vector.broadcast %cst_11 : f32 to vector<8x512xf32>
    %27 = arith.maximumf %25, %26 : vector<8x512xf32>
    %28 = arith.truncf %27 : vector<8x512xf32> to vector<8x512xbf16>
    %c0_12 = arith.constant 0 : index
    %c0_13 = arith.constant 0 : index
    %29 = vector.load %arg4[%c0_12, %c0_13] : memref<512x128xbf16, #tpu.memory_space<vmem>>, vector<512x128xbf16>
    %cst_14 = arith.constant dense<0.000000e+00> : vector<8x128xf32>
    %30 = tpu.matmul %28, %29, %cst_14 {dimension_numbers = #tpu.dot_dimension_numbers<[1], [0], [0], [1], [0, 0, 1, 1], [], []>} : vector<8x512xbf16>, vector<512x128xbf16>, vector<8x128xf32> -> vector<8x128xf32>
    %c0_15 = arith.constant 0 : index
    %c0_16 = arith.constant 0 : index
    %31 = vector.load %arg5[%c0_15, %c0_16] : memref<1x128xf32, #tpu.memory_space<vmem>>, vector<1x128xf32>
    %32 = vector.broadcast %31 : vector<1x128xf32> to vector<8x128xf32>
    %33 = arith.addf %30, %32 : vector<8x128xf32>
    %c0_17 = arith.constant 0 : index
    %c0_18 = arith.constant 0 : index
    %34 = vector.load %arg6[%c0_17, %c0_18] : memref<8x128xf32, #tpu.memory_space<vmem>>, vector<8x128xf32>
    tpu.vector_store %arg6[%c0_17, %c0_18], %33 {strides = array<i32>} : memref<8x128xf32, #tpu.memory_space<vmem>>, vector<8x128xf32>,
    return
  }
  func.func @transform_0(%arg0: i32) -> (i32, i32) {
    %c0_i32 = arith.constant 0 : i32
    %c0_i32_0 = arith.constant 0 : i32
    %c0_i32_1 = arith.constant 0 : i32
    return %c0_i32, %c0_i32_0 : i32, i32
  }
  func.func @transform_1(%arg0: i32) -> (i32, i32) {
    %c0_i32 = arith.constant 0 : i32
    %c0_i32_0 = arith.constant 0 : i32
    %c0_i32_1 = arith.constant 0 : i32
    return %c0_i32, %c0_i32_0 : i32, i32
  }
  func.func @transform_2(%arg0: i32) -> (i32, i32) {
    %c0_i32 = arith.constant 0 : i32
    %c0_i32_0 = arith.constant 0 : i32
    %c0_i32_1 = arith.constant 0 : i32
    return %c0_i32, %c0_i32_0 : i32, i32
  }
  func.func @transform_3(%arg0: i32) -> (i32, i32) {
    %c0_i32 = arith.constant 0 : i32
    %c0_i32_0 = arith.constant 0 : i32
    %c0_i32_1 = arith.constant 0 : i32
    return %c0_i32, %c0_i32_0 : i32, i32
  }
  func.func @transform_4(%arg0: i32) -> (i32, i32) {
    %c0_i32 = arith.constant 0 : i32
    %c0_i32_0 = arith.constant 0 : i32
    %c0_i32_1 = arith.constant 0 : i32
    return %c0_i32, %c0_i32_0 : i32, i32
  }
  func.func @transform_5(%arg0: i32) -> (i32, i32) {
    %c0_i32 = arith.constant 0 : i32
    %c0_i32_0 = arith.constant 0 : i32
    %c0_i32_1 = arith.constant 0 : i32
    return %c0_i32, %c0_i32_0 : i32, i32
  }
}

</mosaic_0001>

<bundles_post_ra>
// kernel: encoder_forward.1
= control target key start
LH: loop header
LB: loop body
LE: loop exit
PB: predicated region body
PF: predicated region fallthrough
CT: control target
= control target key end

     0   :  { %10 = vsyncpa [#allocation3], 0  ;;  %s2900_s0 = inlined_call_operand.hbm [shape: f32[8,784], index: 0, kind: input, shape index: {}]   ;;  %s2901_s1 = inlined_call_operand.hbm [shape: bf16[784,512], index: 1, kind: input, shape index: {}]   ;;  %s2902_s2 = inlined_call_operand.hbm [shape: f32[2,512], index: 2, kind: input, shape index: {}]   ;;  %s2903_s3 = inlined_call_operand.hbm [shape: bf16[512,128], index: 3, kind: input, shape index: {}]   ;;  %s2904_s4 = inlined_call_operand.vmem [shape: f32[1,128], index: 4, kind: input, shape index: {}]   ;;  %s2905_s5 = inlined_call_operand.vmem [shape: f32[8,128], index: 5, kind: output, shape index: {}]  }
   0x1   :  { %11 = vsyncpa [#allocation5], 0 }
   0x2   :  { %12 = vsyncpa [#allocation8], 0  ;;  %s2787_s18 = smov [#allocation4]  }
   0x3   :  { %s28_s19 = sshll.u32 %s2787_s18, 4  ;;  %s29_s19 = int_to_ptr.vmem [resolvable:$true] %s28_s19 }
   0x4   :  { %s2709_s20 = scalar_lea.vmem %s29_s19, 25088  ;;  %p2714_p1 = scmp.lt.s32.totalorder %s29_s19, %s29_s19 }
   0x5   :  { %p2710_p0 = scmp.ne.s32.totalorder %s29_s19, %s2709_s20  ;;  %p2715_p2 = scmp.lt.s32.totalorder %s2709_s20, %s2709_s20 }
   0x7   :  { %p2716_p3 = por %p2715_p2, %p2714_p1 }
   0x9   :  { %p2717_p4 = pnand %p2716_p3, %p2710_p0 }
   0xb   :  { %2720 = shalt.err (!%p2717_p4)
}
   0xc   :  { %s2788_s21 = smov 256   ;;  %s2789_s22 = smov 16  }
   0xd   :  { %34 = dma.hbm_to_vmem [thread:$0]  %s2901_s1, 25088, %s29_s19, [#allocation5], %s2788_s21, %s2788_s21, %s2789_s22  }
   0xe   :  { %s2790_s25 = smov [#allocation2]   ;;  %s2791_s27 = smov [#allocation6]  }
   0xf   :  { %s19_s26 = sshll.u32 %s2790_s25, 4  ;;  %s41_s28 = sshll.u32 %s2791_s27, 4  ;;  %s20_s26 = int_to_ptr.vmem [resolvable:$true] %s19_s26  ;;  %s42_s28 = int_to_ptr.vmem [resolvable:$true] %s41_s28 }
  0x10   :  { %s2729_s29 = scalar_lea.vmem %s20_s26, 896  ;;  %p2734_p6 = scmp.lt.s32.totalorder %s20_s26, %s20_s26 }
  0x11   :  { %p2730_p5 = scmp.ne.s32.totalorder %s20_s26, %s2729_s29  ;;  %p2735_p7 = scmp.lt.s32.totalorder %s2729_s29, %s2729_s29 }
  0x13   :  { %p2736_p8 = por %p2735_p7, %p2734_p6 }
  0x15   :  { %p2737_p9 = pnand %p2736_p8, %p2730_p5 }
  0x17   :  { %2740 = shalt.err (!%p2737_p9)
}
  0x18   :  { %22 = dma.hbm_to_vmem [thread:$0]  %s2900_s0, 896, %s20_s26, [#allocation3]  }
  0x19   :  { %s2749_s7 = scalar_lea.vmem %s42_s28, 128  ;;  %p2754_p11 = scmp.lt.s32.totalorder %s42_s28, %s42_s28 }
  0x1a   :  { %p2750_p10 = scmp.ne.s32.totalorder %s42_s28, %s2749_s7  ;;  %p2755_p12 = scmp.lt.s32.totalorder %s2749_s7, %s2749_s7 }
  0x1c   :  { %p2756_p13 = por %p2755_p12, %p2754_p11 }
  0x1e   :  { %p2757_p0 = pnand %p2756_p13, %p2750_p10 }
  0x20   :  { %2760 = shalt.err (!%p2757_p0)
}
  0x21   :  { %44 = dma.hbm_to_vmem [thread:$0]  %s2902_s2, 128, %s42_s28, [#allocation5]  }
  0x22   :  { %s2792_s9 = smov [#allocation7]  }
  0x23   :  { %s50_s10 = sshll.u32 %s2792_s9, 4  ;;  %s51_s10 = int_to_ptr.vmem [resolvable:$true] %s50_s10 }
  0x24   :  { %s2769_s11 = scalar_lea.vmem %s51_s10, 4096  ;;  %p2774_p2 = scmp.lt.s32.totalorder %s51_s10, %s51_s10 }
  0x25   :  { %p2770_p1 = scmp.ne.s32.totalorder %s51_s10, %s2769_s11  ;;  %p2775_p3 = scmp.lt.s32.totalorder %s2769_s11, %s2769_s11 }
  0x27   :  { %p2776_p4 = por %p2775_p3, %p2774_p2 }
  0x29   :  { %p2777_p5 = pnand %p2776_p4, %p2770_p1 }
  0x2b   :  { %2780 = shalt.err (!%p2777_p5)
}
  0x2c   :  { %s2793_s0 = smov 64   ;;  %s2794_s12 = smov 4  }
  0x2d   :  { %56 = dma.hbm_to_vmem [thread:$0]  %s2903_s3, 4096, %s51_s10, [#allocation8], %s2793_s0, %s2793_s0, %s2794_s12  }
  0x2e   :  { %2781 = dma.done.wait [#allocation3], 896  }
  0x2f   :  { %2782 = vsyncadd [#allocation3], 4294966400 }
  0x30   :  { %2783 = dma.done.wait [#allocation5], 25216  }
  0x31   :  { %2784 = vsyncadd [#allocation5], 4294942080 }
  0x32   :  { %2785 = dma.done.wait [#allocation8], 4096  }
  0x33   :  { %2786 = vsyncadd [#allocation8], 4294963200  ;;  %v2367_v0 = vld [vmem:[#allocation4 + $0xe4] ss:$16 sps:$4 sm:$0xff]   ;;  %v2371_v2 = vld [vmem:[#allocation4 + $0xe0] ss:$16 sps:$4 sm:$0xff]  }
  0x34   :  { %v2369_v1 = vld [vmem:[#allocation4 + $0x2e4] ss:$16 sps:$4 sm:$0xff]   ;;  %1266 = vmatprep.subr.bf16.mxu0 %v2367_v0  ;;  %v2372_v3 = vld [vmem:[#allocation4 + $0x2e0] ss:$16 sps:$4 sm:$0xff]   ;;  %vm1262_vm0 = vcmask 130048  }
  0x35   :  { %1307 = vmatprep.subr.bf16.mxu1 %v2369_v1  ;;  %v2373_v4 = vld [vmem:[#allocation4 + $0xc4] ss:$16 sps:$4 sm:$0xff]   ;;  %1267 = vmatpush1.bf16.msra.mxu0 %v2371_v2  ;;  %v2377_v6 = vld [vmem:[#allocation4 + $0xc0] ss:$16 sps:$4 sm:$0xff]  }
  0x36   :  { %1308 = vmatpush1.bf16.msra.mxu1 %v2372_v3  ;;  %v2375_v5 = vld [vmem:[#allocation4 + $0x2c4] ss:$16 sps:$4 sm:$0xff]   ;;  %1268 = vmatprep.subr.bf16.mxu0 %v2373_v4  ;;  %v2378_v7 = vld [vmem:[#allocation4 + $0x2c0] ss:$16 sps:$4 sm:$0xff]   ;;  %v72_v4 = vld [vmem:[#allocation2] sm:$0xff] }
  0x37   :  { %1309 = vmatprep.subr.bf16.mxu1 %v2375_v5  ;;  %v2379_v8 = vld [vmem:[#allocation4 + $0xa4] ss:$16 sps:$4 sm:$0xff]   ;;  %v2383_v10 = vld [vmem:[#allocation4 + $0xa0] ss:$16 sps:$4 sm:$0xff]   ;;  %v74_v5 = vld [vmem:[#allocation2 + $0x10] sm:$0xff] }
  0x38   :  { %v2381_v9 = vld [vmem:[#allocation4 + $0x2a4] ss:$16 sps:$4 sm:$0xff]   ;;  %v2384_v11 = vld [vmem:[#allocation4 + $0x2a0] ss:$16 sps:$4 sm:$0xff]  }
  0x39   :  { %1269 = vmatpush1.bf16.msra.mxu0 %v2377_v6  ;;  %v2385_v12 = vld [vmem:[#allocation4 + $0x84] ss:$16 sps:$4 sm:$0xff]   ;;  %v2389_v14 = vld [vmem:[#allocation4 + $0x80] ss:$16 sps:$4 sm:$0xff]  }
  0x3a   :  { %1310 = vmatpush1.bf16.msra.mxu1 %v2378_v7  ;;  %1270 = vmatprep.subr.bf16.mxu0 %v2379_v8  ;;  %v2387_v13 = vld [vmem:[#allocation4 + $0x284] ss:$16 sps:$4 sm:$0xff]   ;;  %v2390_v15 = vld [vmem:[#allocation4 + $0x280] ss:$16 sps:$4 sm:$0xff]   ;;  %v2844_v8 = vpack.c.bf16 %v72_v4, %v72_v4  ;;  %v2546_v4 = vld [vmem:[#allocation4 + $0x16c] ss:$16 sps:$4 sm:$0xff]  }
  0x3b   :  { %1311 = vmatprep.subr.bf16.mxu1 %v2381_v9  ;;  %v2391_v16 = vld [vmem:[#allocation4 + $0x64] ss:$16 sps:$4 sm:$0xff]   ;;  %v2395_v18 = vld [vmem:[#allocation4 + $0x60] ss:$16 sps:$4 sm:$0xff]   ;;  %v2846_v9 = vpack.c.bf16 %v74_v5, %v74_v5 }
  0x3c   :  { %v2393_v17 = vld [vmem:[#allocation4 + $0x264] ss:$16 sps:$4 sm:$0xff]   ;;  %v2396_v19 = vld [vmem:[#allocation4 + $0x260] ss:$16 sps:$4 sm:$0xff]  }
  0x3d   :  { %1271 = vmatpush1.bf16.msra.mxu0 %v2383_v10  ;;  %v2397_v20 = vld [vmem:[#allocation4 + $0x44] ss:$16 sps:$4 sm:$0xff]   ;;  %v2401_v22 = vld [vmem:[#allocation4 + $0x40] ss:$16 sps:$4 sm:$0xff]  }
  0x3e   :  { %1312 = vmatpush1.bf16.msra.mxu1 %v2384_v11  ;;  %1272 = vmatprep.subr.bf16.mxu0 %v2385_v12  ;;  %v2399_v21 = vld [vmem:[#allocation4 + $0x244] ss:$16 sps:$4 sm:$0xff]   ;;  %v2402_v23 = vld [vmem:[#allocation4 + $0x240] ss:$16 sps:$4 sm:$0xff]  }
  0x3f   :  { %1313 = vmatprep.subr.bf16.mxu1 %v2387_v13  ;;  %v2403_v24 = vld [vmem:[#allocation4 + $0x24] ss:$16 sps:$4 sm:$0xff]   ;;  %v2407_v26 = vld [vmem:[#allocation4 + $0x20] ss:$16 sps:$4 sm:$0xff]   ;;  %v2474_v13 = vld [vmem:[#allocation4 + $0xec] ss:$16 sps:$4 sm:$0xff]  }
  0x40   :  { %v2405_v25 = vld [vmem:[#allocation4 + $0x224] ss:$16 sps:$4 sm:$0xff]   ;;  %v2408_v27 = vld [vmem:[#allocation4 + $0x220] ss:$16 sps:$4 sm:$0xff]  }
  0x41   :  { %1273 = vmatpush1.bf16.msra.mxu0 %v2389_v14  ;;  %v2409_v28 = vld [vmem:[#allocation4 + $0x4] ss:$16 sps:$4 sm:$0xff]   ;;  %v2413_v30 = vld [vmem:[#allocation4] ss:$16 sps:$4 sm:$0xff]  }
  0x42   :  { %1314 = vmatpush1.bf16.msra.mxu1 %v2390_v15  ;;  %1274 = vmatprep.subr.bf16.mxu0 %v2391_v16  ;;  %v2411_v29 = vld [vmem:[#allocation4 + $0x204] ss:$16 sps:$4 sm:$0xff]   ;;  %v2414_v31 = vld [vmem:[#allocation4 + $0x200] ss:$16 sps:$4 sm:$0xff]   ;;  %v78_v15 = vld [vmem:[#allocation2 + $0x30] sm:$0xff]  ;;  %v2795_v16 = vmov 0  }
  0x43   :  { %1315 = vmatprep.subr.bf16.mxu1 %v2393_v17  ;;  %v2415_v32 = vld [vmem:[#allocation4 + $0x1e4] ss:$16 sps:$4 sm:$0xff]   ;;  %v2419_v34 = vld [vmem:[#allocation4 + $0x1e0] ss:$16 sps:$4 sm:$0xff]  }
  0x44   :  { %v2417_v33 = vld [vmem:[#allocation4 + $0x3e4] ss:$16 sps:$4 sm:$0xff]   ;;  %v2420_v35 = vld [vmem:[#allocation4 + $0x3e0] ss:$16 sps:$4 sm:$0xff]  }
  0x45   :  { %1275 = vmatpush1.bf16.msra.mxu0 %v2395_v18  ;;  %v2421_v36 = vld [vmem:[#allocation4 + $0x1c4] ss:$16 sps:$4 sm:$0xff]   ;;  %v2425_v38 = vld [vmem:[#allocation4 + $0x1c0] ss:$16 sps:$4 sm:$0xff]   ;;  %v2472_v18 = vld [vmem:[#allocation4 + $0xe8] ss:$16 sps:$4 sm:$0xff]  }
  0x46   :  { %1316 = vmatpush1.bf16.msra.mxu1 %v2396_v19  ;;  %1276 = vmatprep.subr.bf16.mxu0 %v2397_v20  ;;  %v2423_v37 = vld [vmem:[#allocation4 + $0x3c4] ss:$16 sps:$4 sm:$0xff]   ;;  %v2426_v39 = vld [vmem:[#allocation4 + $0x3c0] ss:$16 sps:$4 sm:$0xff]   ;;  %v2851_v19 = vpack.c.bf16 %v78_v15, %v78_v15  ;;  %v76_v15 = vld [vmem:[#allocation2 + $0x20] sm:$0xff] }
  0x47   :  { %1317 = vmatprep.subr.bf16.mxu1 %v2399_v21  ;;  %v2427_v40 = vld [vmem:[#allocation4 + $0x1a4] ss:$16 sps:$4 sm:$0xff]   ;;  %v2431_v42 = vld [vmem:[#allocation4 + $0x1a0] ss:$16 sps:$4 sm:$0xff]   ;;  %v2480_v21 = vld [vmem:[#allocation4 + $0xcc] ss:$16 sps:$4 sm:$0xff]  }
  0x48   :  { %v2429_v41 = vld [vmem:[#allocation4 + $0x3a4] ss:$16 sps:$4 sm:$0xff]   ;;  %v2432_v43 = vld [vmem:[#allocation4 + $0x3a0] ss:$16 sps:$4 sm:$0xff]  }
  0x49   :  { %1277 = vmatpush1.bf16.msra.mxu0 %v2401_v22  ;;  %v2433_v44 = vld [vmem:[#allocation4 + $0x184] ss:$16 sps:$4 sm:$0xff]   ;;  %v2437_v47 = vld [vmem:[#allocation4 + $0x180] ss:$16 sps:$4 sm:$0xff]  }
  0x4a   :  { %1318 = vmatpush1.bf16.msra.mxu1 %v2402_v23  ;;  %1278 = vmatprep.subr.bf16.mxu0 %v2403_v24  ;;  %v2435_v45 = vld [vmem:[#allocation4 + $0x384] ss:$16 sps:$4 sm:$0xff]   ;;  %v2438_v48 = vld [vmem:[#allocation4 + $0x380] ss:$16 sps:$4 sm:$0xff]   ;;  %v2478_v23 = vld [vmem:[#allocation4 + $0xc8] ss:$16 sps:$4 sm:$0xff]  }
  0x4b   :  { %1319 = vmatprep.subr.bf16.mxu1 %v2405_v25  ;;  %v73_v46 = vld [vmem:[#allocation2 + $0x8] sm:$0xff]  ;;  %v75_v50 = vld [vmem:[#allocation2 + $0x18] sm:$0xff]  ;;  %v2486_v25 = vld [vmem:[#allocation4 + $0xac] ss:$16 sps:$4 sm:$0xff]  }
  0x4c   :  { %v2838_v49 = vpack.c.bf16 %v73_v46, %v73_v46  ;;  %v2439_v51 = vld [vmem:[#allocation4 + $0x164] ss:$16 sps:$4 sm:$0xff]   ;;  %v2840_v52 = vpack.c.bf16 %v75_v50, %v75_v50  ;;  %v2443_v54 = vld [vmem:[#allocation4 + $0x160] ss:$16 sps:$4 sm:$0xff]  }
  0x4d   :  { %1279 = vmatpush1.bf16.msra.mxu0 %v2407_v26  ;;  %v2441_v53 = vld [vmem:[#allocation4 + $0x364] ss:$16 sps:$4 sm:$0xff]   ;;  %v2444_v55 = vld [vmem:[#allocation4 + $0x360] ss:$16 sps:$4 sm:$0xff]  }
  0x4e   :  { %1320 = vmatpush1.bf16.msra.mxu1 %v2408_v27  ;;  %1280 = vmatprep.subr.bf16.mxu0 %v2409_v28  ;;  %v2445_v56 = vld [vmem:[#allocation4 + $0x144] ss:$16 sps:$4 sm:$0xff]   ;;  %v2449_v58 = vld [vmem:[#allocation4 + $0x140] ss:$16 sps:$4 sm:$0xff]   ;;  %v2484_v27 = vld [vmem:[#allocation4 + $0xa8] ss:$16 sps:$4 sm:$0xff]  }
  0x4f   :  { %1321 = vmatprep.subr.bf16.mxu1 %v2411_v29  ;;  %1298 = vmatprep.mubr.bf16.mxu0 %v2838_v49  ;;  %v2447_v57 = vld [vmem:[#allocation4 + $0x344] ss:$16 sps:$4 sm:$0xff]   ;;  %v2450_v59 = vld [vmem:[#allocation4 + $0x340] ss:$16 sps:$4 sm:$0xff]   ;;  %v2492_v29 = vld [vmem:[#allocation4 + $0x8c] ss:$16 sps:$4 sm:$0xff]  }
  0x50   :  { %1339 = vmatprep.mubr.bf16.mxu1 %v2840_v52  ;;  %v2451_v60 = vld [vmem:[#allocation4 + $0x124] ss:$16 sps:$4 sm:$0xff]   ;;  %v2455_v62 = vld [vmem:[#allocation4 + $0x120] ss:$16 sps:$4 sm:$0xff]  }
  0x51   :  { %1281 = vmatpush1.bf16.msra.mxu0 %v2413_v30  ;;  %v2453_v61 = vld [vmem:[#allocation4 + $0x324] ss:$16 sps:$4 sm:$0xff]   ;;  %v2456_v63 = vld [vmem:[#allocation4 + $0x320] ss:$16 sps:$4 sm:$0xff]  }
  0x52   :  { %1322 = vmatpush1.bf16.msra.mxu1 %v2414_v31  ;;  %1282 = vmatprep.subr.bf16.mxu0 %v2415_v32  ;;  %v2457_v0 = vld [vmem:[#allocation4 + $0x104] ss:$16 sps:$4 sm:$0xff]   ;;  %v2461_v2 = vld [vmem:[#allocation4 + $0x100] ss:$16 sps:$4 sm:$0xff]   ;;  %v2490_v31 = vld [vmem:[#allocation4 + $0x88] ss:$16 sps:$4 sm:$0xff]  }
  0x53   :  { %1323 = vmatprep.subr.bf16.mxu1 %v2417_v33  ;;  %v2459_v1 = vld [vmem:[#allocation4 + $0x304] ss:$16 sps:$4 sm:$0xff]   ;;  %v2462_v3 = vld [vmem:[#allocation4 + $0x300] ss:$16 sps:$4 sm:$0xff]   ;;  %v2498_v33 = vld [vmem:[#allocation4 + $0x6c] ss:$16 sps:$4 sm:$0xff]  }
  0x54   :  { %v2465_v6 = vld [vmem:[#allocation4 + $0x4e4] ss:$16 sps:$4 sm:$0xff]   ;;  %v2463_v10 = vld [vmem:[#allocation4 + $0x4e0] ss:$16 sps:$4 sm:$0xff]  }
  0x55   :  { %1283 = vmatpush2.bf16.msra.mxu0 %v2419_v34  ;;  %v2468_v7 = vld [vmem:[#allocation4 + $0x604] ss:$16 sps:$4 sm:$0xff]   ;;  %v2466_v11 = vld [vmem:[#allocation4 + $0x600] ss:$16 sps:$4 sm:$0xff]  }
  0x56   :  { %1324 = vmatpush2.bf16.msra.mxu1 %v2420_v35  ;;  %1284 = vmatprep.subr.bf16.mxu0 %v2421_v36  ;;  %v2471_v12 = vld [vmem:[#allocation4 + $0x4c4] ss:$16 sps:$4 sm:$0xff]   ;;  %v2469_v14 = vld [vmem:[#allocation4 + $0x4c0] ss:$16 sps:$4 sm:$0xff]  }
  0x57   :  { %1325 = vmatprep.subr.bf16.mxu1 %v2423_v37  ;;  %v2477_v17 = vld [vmem:[#allocation4 + $0x4a4] ss:$16 sps:$4 sm:$0xff]   ;;  %v2475_v20 = vld [vmem:[#allocation4 + $0x4a0] ss:$16 sps:$4 sm:$0xff]   ;;  %v2496_v37 = vld [vmem:[#allocation4 + $0x68] ss:$16 sps:$4 sm:$0xff]  }
  0x58   :  { %v2483_v22 = vld [vmem:[#allocation4 + $0x484] ss:$16 sps:$4 sm:$0xff]   ;;  %v2481_v24 = vld [vmem:[#allocation4 + $0x480] ss:$16 sps:$4 sm:$0xff]  }
  0x59   :  { %1285 = vmatpush2.bf16.msra.mxu0 %v2425_v38  ;;  %v2489_v26 = vld [vmem:[#allocation4 + $0x464] ss:$16 sps:$4 sm:$0xff]   ;;  %v2487_v28 = vld [vmem:[#allocation4 + $0x460] ss:$16 sps:$4 sm:$0xff]  }
  0x5a   :  { %1326 = vmatpush2.bf16.msra.mxu1 %v2426_v39  ;;  %1286 = vmatprep.subr.bf16.mxu0 %v2427_v40  ;;  %v2495_v30 = vld [vmem:[#allocation4 + $0x444] ss:$16 sps:$4 sm:$0xff]   ;;  %v2493_v32 = vld [vmem:[#allocation4 + $0x440] ss:$16 sps:$4 sm:$0xff]   ;;  %v2504_v39 = vld [vmem:[#allocation4 + $0x4c] ss:$16 sps:$4 sm:$0xff]  }
  0x5b   :  { %1327 = vmatprep.subr.bf16.mxu1 %v2429_v41  ;;  %v2501_v34 = vld [vmem:[#allocation4 + $0x424] ss:$16 sps:$4 sm:$0xff]   ;;  %v2499_v38 = vld [vmem:[#allocation4 + $0x420] ss:$16 sps:$4 sm:$0xff]   ;;  %v2502_v41 = vld [vmem:[#allocation4 + $0x48] ss:$16 sps:$4 sm:$0xff]  }
  0x5c   :  { %v77_v35 = vld [vmem:[#allocation2 + $0x28] sm:$0xff] }
  0x5d   :  { %1287 = vmatpush2.bf16.msra.mxu0 %v2431_v42  ;;  %v2856_v36 = vpack.c.bf16 %v77_v35, %v77_v35  ;;  %v2507_v40 = vld [vmem:[#allocation4 + $0x404] ss:$16 sps:$4 sm:$0xff]   ;;  %v2505_v42 = vld [vmem:[#allocation4 + $0x400] ss:$16 sps:$4 sm:$0xff]   ;;  %v2585_v35 = vld [vmem:[#allocation4 + $0x26c] ss:$16 sps:$4 sm:$0xff]  }
  0x5e   :  { %1328 = vmatpush2.bf16.msra.mxu1 %v2432_v43  ;;  %1288 = vmatprep.subr.bf16.mxu0 %v2433_v44  ;;  %v2510_v43 = vld [vmem:[#allocation4 + $0x2c] ss:$16 sps:$4 sm:$0xff]   ;;  %v2513_v44 = vld [vmem:[#allocation4 + $0x5e4] ss:$16 sps:$4 sm:$0xff]   ;;  %v2511_v46 = vld [vmem:[#allocation4 + $0x5e0] ss:$16 sps:$4 sm:$0xff]  }
  0x5f   :  { %1329 = vmatprep.subr.bf16.mxu1 %v2435_v45  ;;  %v2508_v45 = vld [vmem:[#allocation4 + $0x28] ss:$16 sps:$4 sm:$0xff]   ;;  %v2517_v50 = vld [vmem:[#allocation4 + $0x5c0] ss:$16 sps:$4 sm:$0xff]   ;;  %v2549_v5 = vld [vmem:[#allocation4 + $0x524] ss:$16 sps:$4 sm:$0xff]  }
  0x61   :  { %1289 = vmatpush2.bf16.msra.mxu0 %v2437_v47  ;;  %v2516_v47 = vld [vmem:[#allocation4 + $0xc] ss:$16 sps:$4 sm:$0xff]  }
  0x62   :  { %1330 = vmatpush2.bf16.msra.mxu1 %v2438_v48  ;;  %1290 = vmatprep.subr.bf16.mxu0 %v2439_v51  ;;  %v2519_v48 = vld [vmem:[#allocation4 + $0x5c4] ss:$16 sps:$4 sm:$0xff]   ;;  %v2522_v51 = vld [vmem:[#allocation4 + $0x1ec] ss:$16 sps:$4 sm:$0xff]  }
  0x63   :  { %1331 = vmatprep.subr.bf16.mxu1 %v2441_v53  ;;  %v2525_v53 = vld [vmem:[#allocation4 + $0x5a4] ss:$16 sps:$4 sm:$0xff]  }
  0x65   :  { %1291 = vmatpush2.bf16.msra.mxu0 %v2443_v54  ;;  %v2520_v54 = vld [vmem:[#allocation4 + $0x1e8] ss:$16 sps:$4 sm:$0xff]  }
  0x66   :  { %1332 = vmatpush2.bf16.msra.mxu1 %v2444_v55  ;;  %1292 = vmatprep.subr.bf16.mxu0 %v2445_v56  ;;  %v2523_v55 = vld [vmem:[#allocation4 + $0x5a0] ss:$16 sps:$4 sm:$0xff]   ;;  %v2528_v56 = vld [vmem:[#allocation4 + $0x1cc] ss:$16 sps:$4 sm:$0xff]  }
  0x67   :  { %1333 = vmatprep.subr.bf16.mxu1 %v2447_v57  ;;  %v2531_v57 = vld [vmem:[#allocation4 + $0x584] ss:$16 sps:$4 sm:$0xff]  }
  0x69   :  { %1293 = vmatpush2.bf16.msra.mxu0 %v2449_v58  ;;  %v2526_v58 = vld [vmem:[#allocation4 + $0x1c8] ss:$16 sps:$4 sm:$0xff]  }
  0x6a   :  { %1334 = vmatpush2.bf16.msra.mxu1 %v2450_v59  ;;  %1294 = vmatprep.subr.bf16.mxu0 %v2451_v60  ;;  %v2529_v59 = vld [vmem:[#allocation4 + $0x580] ss:$16 sps:$4 sm:$0xff]   ;;  %v2534_v60 = vld [vmem:[#allocation4 + $0x1ac] ss:$16 sps:$4 sm:$0xff]  }
  0x6b   :  { %1335 = vmatprep.subr.bf16.mxu1 %v2453_v61  ;;  %v2537_v61 = vld [vmem:[#allocation4 + $0x564] ss:$16 sps:$4 sm:$0xff]  }
  0x6d   :  { %1295 = vmatpush2.bf16.msra.mxu0 %v2455_v62  ;;  %v2532_v62 = vld [vmem:[#allocation4 + $0x1a8] ss:$16 sps:$4 sm:$0xff]  }
  0x6e   :  { %1336 = vmatpush2.bf16.msra.mxu1 %v2456_v63  ;;  %1296 = vmatprep.subr.bf16.mxu0 %v2457_v0  ;;  %v2535_v63 = vld [vmem:[#allocation4 + $0x560] ss:$16 sps:$4 sm:$0xff]   ;;  %v2540_v0 = vld [vmem:[#allocation4 + $0x18c] ss:$16 sps:$4 sm:$0xff]  }
  0x6f   :  { %1337 = vmatprep.subr.bf16.mxu1 %v2459_v1  ;;  %v2543_v1 = vld [vmem:[#allocation4 + $0x544] ss:$16 sps:$4 sm:$0xff]  }
  0x71   :  { %1297 = vmatpush2.bf16.msra.mxu0 %v2461_v2  ;;  %v2538_v2 = vld [vmem:[#allocation4 + $0x188] ss:$16 sps:$4 sm:$0xff]  }
  0x72   :  { %1338 = vmatpush2.bf16.msra.mxu1 %v2462_v3  ;;  %1348 = vmatprep.subr.bf16.mxu0 %v2465_v6  ;;  %v2541_v3 = vld [vmem:[#allocation4 + $0x540] ss:$16 sps:$4 sm:$0xff]   ;;  %v2544_v6 = vld [vmem:[#allocation4 + $0x168] ss:$16 sps:$4 sm:$0xff]  }
  0x73   :  { %1403 = vmatprep.subr.bf16.mxu1 %v2468_v7  ;;  %v2547_v7 = vld [vmem:[#allocation4 + $0x520] ss:$16 sps:$4 sm:$0xff]  }
  0x74   :  { %1299 = vmatmul.mubr.bf16.vlgmr.msra.gmra.mxu0 %v2844_v8 }
  0x75   :  { %1340 = vmatmul.mubr.bf16.vlgmr.msra.gmra.mxu1 %v2846_v9  ;;  %1349 = vmatpush1.bf16.msra.mxu0 %v2463_v10  ;;  %v2552_v10 = vld [vmem:[#allocation4 + $0x14c] ss:$16 sps:$4 sm:$0xff]  }
  0x76   :  { %1404 = vmatpush1.bf16.msra.mxu1 %v2466_v11  ;;  %1350 = vmatprep.subr.bf16.mxu0 %v2471_v12  ;;  %v2555_v11 = vld [vmem:[#allocation4 + $0x504] ss:$16 sps:$4 sm:$0xff]   ;;  %v2550_v12 = vld [vmem:[#allocation4 + $0x148] ss:$16 sps:$4 sm:$0xff]  }
  0x77   :  { %1421 = vmatprep.mubr.bf16.mxu1 %v2795_v16  ;;  %1430 = vmatprep.subr.bf16.mxu1 %v2474_v13  ;;  %v2553_v13 = vld [vmem:[#allocation4 + $0x500] ss:$16 sps:$4 sm:$0xff]  }
  0x78   :  { %1380 = vmatprep.mubr.bf16.mxu0 %v2856_v36 }
  0x79   :  { %1351 = vmatpush1.bf16.msra.mxu0 %v2469_v14  ;;  %v2558_v14 = vld [vmem:[#allocation4 + $0x12c] ss:$16 sps:$4 sm:$0xff]  }
  0x7a   :  { %1352 = vmatprep.subr.bf16.mxu0 %v2477_v17  ;;  %v2561_v17 = vld [vmem:[#allocation4 + $0x2ec] ss:$16 sps:$4 sm:$0xff]  }
  0x7d   :  { %2279 = vmatmul.mubr.msk.bf16.vlgmr.msra.gmra.mxu1 %vm1262_vm0, %v2851_v19  ;;  %1353 = vmatpush1.bf16.msra.mxu0 %v2475_v20  ;;  %v2859_v20 = vpack.c.bf16 %v76_v15, %v76_v15  ;;  %v2648_v15 = vld [vmem:[#allocation4 + $0x54c] ss:$16 sps:$4 sm:$0xff]  }
  0x7e   :  { %1431 = vmatpush1.bf16.msra.mxu1 %v2472_v18  ;;  %1354 = vmatprep.subr.bf16.mxu0 %v2483_v22  ;;  %v2556_v18 = vld [vmem:[#allocation4 + $0x128] ss:$16 sps:$4 sm:$0xff]   ;;  %v2564_v22 = vld [vmem:[#allocation4 + $0x10c] ss:$16 sps:$4 sm:$0xff]  }
  0x7f   :  { %1432 = vmatprep.subr.bf16.mxu1 %v2480_v21  ;;  %1462 = vmatprep.mubr.bf16.mxu1 %v2838_v49  ;;  %v2514_v49 = vld [vmem:[#allocation4 + $0x8] ss:$16 sps:$4 sm:$0xff]  }
  0x80   :  { %v2559_v21 = vld [vmem:[#allocation4 + $0x2e8] ss:$16 sps:$4 sm:$0xff]  }
  0x81   :  { %1355 = vmatpush1.bf16.msra.mxu0 %v2481_v24  ;;  %v2562_v24 = vld [vmem:[#allocation4 + $0x108] ss:$16 sps:$4 sm:$0xff]  }
  0x82   :  { %1433 = vmatpush1.bf16.msra.mxu1 %v2478_v23  ;;  %1356 = vmatprep.subr.bf16.mxu0 %v2489_v26  ;;  %v2567_v23 = vld [vmem:[#allocation4 + $0x2cc] ss:$16 sps:$4 sm:$0xff]  }
  0x83   :  { %1434 = vmatprep.subr.bf16.mxu1 %v2486_v25  ;;  %v2565_v25 = vld [vmem:[#allocation4 + $0x2c8] ss:$16 sps:$4 sm:$0xff]   ;;  %v2570_v26 = vld [vmem:[#allocation4 + $0x4ec] ss:$16 sps:$4 sm:$0xff]  }
  0x85   :  { %1357 = vmatpush1.bf16.msra.mxu0 %v2487_v28  ;;  %v2568_v28 = vld [vmem:[#allocation4 + $0x4e8] ss:$16 sps:$4 sm:$0xff]  }
  0x86   :  { %1435 = vmatpush1.bf16.msra.mxu1 %v2484_v27  ;;  %1358 = vmatprep.subr.bf16.mxu0 %v2495_v30  ;;  %v2573_v27 = vld [vmem:[#allocation4 + $0x2ac] ss:$16 sps:$4 sm:$0xff]  }
  0x87   :  { %1436 = vmatprep.subr.bf16.mxu1 %v2492_v29  ;;  %v2571_v29 = vld [vmem:[#allocation4 + $0x2a8] ss:$16 sps:$4 sm:$0xff]   ;;  %v2576_v30 = vld [vmem:[#allocation4 + $0x4cc] ss:$16 sps:$4 sm:$0xff]  }
  0x89   :  { %1359 = vmatpush1.bf16.msra.mxu0 %v2493_v32  ;;  %v2574_v32 = vld [vmem:[#allocation4 + $0x4c8] ss:$16 sps:$4 sm:$0xff]  }
  0x8a   :  { %1437 = vmatpush1.bf16.msra.mxu1 %v2490_v31  ;;  %1360 = vmatprep.subr.bf16.mxu0 %v2501_v34  ;;  %v2579_v31 = vld [vmem:[#allocation4 + $0x28c] ss:$16 sps:$4 sm:$0xff]  }
  0x8b   :  { %1438 = vmatprep.subr.bf16.mxu1 %v2498_v33  ;;  %v2577_v33 = vld [vmem:[#allocation4 + $0x288] ss:$16 sps:$4 sm:$0xff]   ;;  %v2582_v34 = vld [vmem:[#allocation4 + $0x4ac] ss:$16 sps:$4 sm:$0xff]  }
  0x8d   :  { %1361 = vmatpush1.bf16.msra.mxu0 %v2499_v38  ;;  %v2583_v38 = vld [vmem:[#allocation4 + $0x268] ss:$16 sps:$4 sm:$0xff]  }
  0x8e   :  { %1439 = vmatpush1.bf16.msra.mxu1 %v2496_v37  ;;  %1362 = vmatprep.subr.bf16.mxu0 %v2507_v40  ;;  %v2580_v37 = vld [vmem:[#allocation4 + $0x4a8] ss:$16 sps:$4 sm:$0xff]  }
  0x8f   :  { %1440 = vmatprep.subr.bf16.mxu1 %v2504_v39  ;;  %v2591_v39 = vld [vmem:[#allocation4 + $0x24c] ss:$16 sps:$4 sm:$0xff]   ;;  %v2586_v40 = vld [vmem:[#allocation4 + $0x488] ss:$16 sps:$4 sm:$0xff]  }
  0x91   :  { %1363 = vmatpush1.bf16.msra.mxu0 %v2505_v42  ;;  %v2594_v42 = vld [vmem:[#allocation4 + $0x46c] ss:$16 sps:$4 sm:$0xff]  }
  0x92   :  { %1441 = vmatpush1.bf16.msra.mxu1 %v2502_v41  ;;  %1364 = vmatprep.subr.bf16.mxu0 %v2513_v44  ;;  %v2589_v41 = vld [vmem:[#allocation4 + $0x248] ss:$16 sps:$4 sm:$0xff]  }
  0x93   :  { %1442 = vmatprep.subr.bf16.mxu1 %v2510_v43  ;;  %v2592_v43 = vld [vmem:[#allocation4 + $0x468] ss:$16 sps:$4 sm:$0xff]  }
  0x94   :  { %v2595_v44 = vld [vmem:[#allocation4 + $0x228] ss:$16 sps:$4 sm:$0xff]  }
  0x95   :  { %1365 = vmatpush2.bf16.msra.mxu0 %v2511_v46  ;;  %v2603_v46 = vld [vmem:[#allocation4 + $0x20c] ss:$16 sps:$4 sm:$0xff]  }
  0x96   :  { %1443 = vmatpush1.bf16.msra.mxu1 %v2508_v45  ;;  %1366 = vmatprep.subr.bf16.mxu0 %v2519_v48  ;;  %v2600_v45 = vld [vmem:[#allocation4 + $0x44c] ss:$16 sps:$4 sm:$0xff]  }
  0x97   :  { %1444 = vmatprep.subr.bf16.mxu1 %v2516_v47  ;;  %v2601_v47 = vld [vmem:[#allocation4 + $0x208] ss:$16 sps:$4 sm:$0xff]   ;;  %v2606_v48 = vld [vmem:[#allocation4 + $0x42c] ss:$16 sps:$4 sm:$0xff]  }
  0x99   :  { %1367 = vmatpush2.bf16.msra.mxu0 %v2517_v50  ;;  %v2604_v50 = vld [vmem:[#allocation4 + $0x428] ss:$16 sps:$4 sm:$0xff]  }
  0x9a   :  { %1445 = vmatpush1.bf16.msra.mxu1 %v2514_v49  ;;  %1368 = vmatprep.subr.bf16.mxu0 %v2525_v53  ;;  %v2609_v49 = vld [vmem:[#allocation4 + $0x3ec] ss:$16 sps:$4 sm:$0xff]  }
  0x9b   :  { %1446 = vmatprep.subr.bf16.mxu1 %v2522_v51  ;;  %v2607_v51 = vld [vmem:[#allocation4 + $0x3e8] ss:$16 sps:$4 sm:$0xff]   ;;  %v2612_v53 = vld [vmem:[#allocation4 + $0x40c] ss:$16 sps:$4 sm:$0xff]  }
  0x9d   :  { %1369 = vmatpush2.bf16.msra.mxu0 %v2523_v55  ;;  %v2610_v55 = vld [vmem:[#allocation4 + $0x408] ss:$16 sps:$4 sm:$0xff]  }
  0x9e   :  { %1447 = vmatpush2.bf16.msra.mxu1 %v2520_v54  ;;  %1370 = vmatprep.subr.bf16.mxu0 %v2531_v57  ;;  %v2615_v54 = vld [vmem:[#allocation4 + $0x3cc] ss:$16 sps:$4 sm:$0xff]  }
  0x9f   :  { %1448 = vmatprep.subr.bf16.mxu1 %v2528_v56  ;;  %v2613_v56 = vld [vmem:[#allocation4 + $0x3c8] ss:$16 sps:$4 sm:$0xff]   ;;  %v2618_v57 = vld [vmem:[#allocation4 + $0x5ec] ss:$16 sps:$4 sm:$0xff]  }
  0xa1   :  { %1371 = vmatpush2.bf16.msra.mxu0 %v2529_v59  ;;  %v2616_v59 = vld [vmem:[#allocation4 + $0x5e8] ss:$16 sps:$4 sm:$0xff]  }
  0xa2   :  { %1449 = vmatpush2.bf16.msra.mxu1 %v2526_v58  ;;  %1372 = vmatprep.subr.bf16.mxu0 %v2537_v61  ;;  %v2621_v58 = vld [vmem:[#allocation4 + $0x3ac] ss:$16 sps:$4 sm:$0xff]  }
  0xa3   :  { %1450 = vmatprep.subr.bf16.mxu1 %v2534_v60  ;;  %v2619_v60 = vld [vmem:[#allocation4 + $0x3a8] ss:$16 sps:$4 sm:$0xff]   ;;  %v2624_v61 = vld [vmem:[#allocation4 + $0x5cc] ss:$16 sps:$4 sm:$0xff]  }
  0xa5   :  { %1373 = vmatpush2.bf16.msra.mxu0 %v2535_v63  ;;  %v2622_v63 = vld [vmem:[#allocation4 + $0x5c8] ss:$16 sps:$4 sm:$0xff]  }
  0xa6   :  { %1451 = vmatpush2.bf16.msra.mxu1 %v2532_v62  ;;  %1374 = vmatprep.subr.bf16.mxu0 %v2543_v1  ;;  %v2627_v62 = vld [vmem:[#allocation4 + $0x38c] ss:$16 sps:$4 sm:$0xff]  }
  0xa7   :  { %1452 = vmatprep.subr.bf16.mxu1 %v2540_v0  ;;  %v2625_v0 = vld [vmem:[#allocation4 + $0x388] ss:$16 sps:$4 sm:$0xff]   ;;  %v2630_v1 = vld [vmem:[#allocation4 + $0x5ac] ss:$16 sps:$4 sm:$0xff]  }
  0xa9   :  { %1375 = vmatpush2.bf16.msra.mxu0 %v2541_v3  ;;  %v2628_v3 = vld [vmem:[#allocation4 + $0x5a8] ss:$16 sps:$4 sm:$0xff]  }
  0xaa   :  { %1453 = vmatpush2.bf16.msra.mxu1 %v2538_v2  ;;  %1376 = vmatprep.subr.bf16.mxu0 %v2549_v5  ;;  %v2633_v2 = vld [vmem:[#allocation4 + $0x36c] ss:$16 sps:$4 sm:$0xff]  }
  0xab   :  { %1454 = vmatprep.subr.bf16.mxu1 %v2546_v4  ;;  %v2631_v4 = vld [vmem:[#allocation4 + $0x368] ss:$16 sps:$4 sm:$0xff]   ;;  %v2636_v5 = vld [vmem:[#allocation4 + $0x58c] ss:$16 sps:$4 sm:$0xff]  }
  0xad   :  { %1377 = vmatpush2.bf16.msra.mxu0 %v2547_v7  ;;  %v2634_v7 = vld [vmem:[#allocation4 + $0x588] ss:$16 sps:$4 sm:$0xff]  }
  0xae   :  { %1455 = vmatpush2.bf16.msra.mxu1 %v2544_v6  ;;  %1378 = vmatprep.subr.bf16.mxu0 %v2555_v11  ;;  %v2639_v6 = vld [vmem:[#allocation4 + $0x34c] ss:$16 sps:$4 sm:$0xff]  }
  0xaf   :  { %1456 = vmatprep.subr.bf16.mxu1 %v2552_v10  ;;  %v2637_v10 = vld [vmem:[#allocation4 + $0x348] ss:$16 sps:$4 sm:$0xff]   ;;  %v2642_v11 = vld [vmem:[#allocation4 + $0x56c] ss:$16 sps:$4 sm:$0xff]  }
  0xb1   :  { %1379 = vmatpush2.bf16.msra.mxu0 %v2553_v13  ;;  %v2640_v13 = vld [vmem:[#allocation4 + $0x568] ss:$16 sps:$4 sm:$0xff]  }
  0xb2   :  { %1457 = vmatpush2.bf16.msra.mxu1 %v2550_v12  ;;  %1471 = vmatprep.subr.bf16.mxu0 %v2561_v17  ;;  %v2645_v12 = vld [vmem:[#allocation4 + $0x32c] ss:$16 sps:$4 sm:$0xff]  }
  0xb3   :  { %1458 = vmatprep.subr.bf16.mxu1 %v2558_v14  ;;  %v2643_v14 = vld [vmem:[#allocation4 + $0x328] ss:$16 sps:$4 sm:$0xff]   ;;  %v2651_v17 = vld [vmem:[#allocation4 + $0x30c] ss:$16 sps:$4 sm:$0xff]  }
  0xb4   :  { %1381 = vmatmul.mubr.bf16.vlgmr.msra.gmra.mxu0 %v2859_v20 }
  0xb5   :  { %1472 = vmatpush1.bf16.msra.mxu0 %v2559_v21  ;;  %1503 = vmatprep.mubr.bf16.mxu0 %v2840_v52  ;;  %v2588_v52 = vld [vmem:[#allocation4 + $0x48c] ss:$16 sps:$4 sm:$0xff]   ;;  %v2649_v21 = vld [vmem:[#allocation4 + $0x308] ss:$16 sps:$4 sm:$0xff]  }
  0xb6   :  { %1459 = vmatpush2.bf16.msra.mxu1 %v2556_v18  ;;  %1473 = vmatprep.subr.bf16.mxu0 %v2567_v23  ;;  %v2646_v18 = vld [vmem:[#allocation4 + $0x548] ss:$16 sps:$4 sm:$0xff]   ;;  %v2657_v23 = vld [vmem:[#allocation4 + $0x60c] ss:$16 sps:$4 sm:$0xff]  }
  0xb7   :  { %1460 = vmatprep.subr.bf16.mxu1 %v2564_v22  ;;  %v2654_v22 = vld [vmem:[#allocation4 + $0x52c] ss:$16 sps:$4 sm:$0xff]  }
  0xb9   :  { %1474 = vmatpush1.bf16.msra.mxu0 %v2565_v25  ;;  %v2655_v25 = vld [vmem:[#allocation4 + $0x608] ss:$16 sps:$4 sm:$0xff]  }
  0xba   :  { %1461 = vmatpush2.bf16.msra.mxu1 %v2562_v24  ;;  %1475 = vmatprep.subr.bf16.mxu0 %v2573_v27  ;;  %v2652_v24 = vld [vmem:[#allocation4 + $0x528] ss:$16 sps:$4 sm:$0xff]  }
  0xbb   :  { %1512 = vmatprep.subr.bf16.mxu1 %v2570_v26  ;;  %v2660_v26 = vld [vmem:[#allocation4 + $0x50c] ss:$16 sps:$4 sm:$0xff]   ;;  %v2658_v27 = vld [vmem:[#allocation4 + $0x508] ss:$16 sps:$4 sm:$0xff]  }
  0xbd   :  { %1463 = vmatmul.mubr.bf16.vlgmr.msra.gmra.mxu1 %v2844_v8  ;;  %1476 = vmatpush1.bf16.msra.mxu0 %v2571_v29  ;;  %v2597_v8 = vld [vmem:[#allocation4 + $0x22c] ss:$16 sps:$4 sm:$0xff]   ;;  %v2662_v29 = vld [vmem:[#allocation7 + $0x38] sm:$0xff]  }
  0xbe   :  { %1513 = vmatpush1.bf16.msra.mxu1 %v2568_v28  ;;  %1477 = vmatprep.subr.bf16.mxu0 %v2579_v31  ;;  %v2661_v28 = vld [vmem:[#allocation7 + $0x78] sm:$0xff]   ;;  %v2664_v31 = vld [vmem:[#allocation7 + $0x30] sm:$0xff]  }
  0xbf   :  { %1514 = vmatprep.subr.bf16.mxu1 %v2576_v30  ;;  %1544 = vmatprep.mubr.bf16.mxu1 %v2856_v36  ;;  %v2598_v36 = vld [vmem:[#allocation4 + $0x448] ss:$16 sps:$4 sm:$0xff]  }
  0xc0   :  { %v2663_v30 = vld [vmem:[#allocation7 + $0x70] sm:$0xff]  }
  0xc1   :  { %1478 = vmatpush1.bf16.msra.mxu0 %v2577_v33  ;;  %v2667_v33 = vld [vmem:[#allocation7 + $0x60] sm:$0xff]  }
  0xc2   :  { %1515 = vmatpush1.bf16.msra.mxu1 %v2574_v32  ;;  %1479 = vmatprep.subr.bf16.mxu0 %v2585_v35  ;;  %v2666_v32 = vld [vmem:[#allocation7 + $0x28] sm:$0xff]   ;;  %v2672_v35 = vld [vmem:[#allocation7 + $0x10] sm:$0xff]  }
  0xc3   :  { %1516 = vmatprep.subr.bf16.mxu1 %v2582_v34  ;;  %v2670_v34 = vld [vmem:[#allocation7 + $0x18] sm:$0xff]  }
  0xc5   :  { %1480 = vmatpush1.bf16.msra.mxu0 %v2583_v38  ;;  %v2674_v38 = vld [vmem:[#allocation7 + $0x8] sm:$0xff]  }
  0xc6   :  { %1517 = vmatpush1.bf16.msra.mxu1 %v2580_v37  ;;  %1481 = vmatprep.subr.bf16.mxu0 %v2591_v39  ;;  %v2673_v37 = vld [vmem:[#allocation7 + $0x48] sm:$0xff]   ;;  %v2676_v39 = vld [vmem:[#allocation7] sm:$0xff]  }
  0xc7   :  { %1518 = vmatprep.subr.bf16.mxu1 %v2588_v52  ;;  %v2675_v52 = vld [vmem:[#allocation7 + $0x40] sm:$0xff]  }
  0xc9   :  { %1482 = vmatpush1.bf16.msra.mxu0 %v2589_v41 }
  0xca   :  { %1519 = vmatpush1.bf16.msra.mxu1 %v2586_v40  ;;  %1483 = vmatprep.subr.bf16.mxu0 %v2597_v8 }
  0xcb   :  { %1520 = vmatprep.subr.bf16.mxu1 %v2594_v42 }
  0xcd   :  { %1484 = vmatpush1.bf16.msra.mxu0 %v2595_v44 }
  0xce   :  { %1521 = vmatpush1.bf16.msra.mxu1 %v2592_v43  ;;  %1485 = vmatprep.subr.bf16.mxu0 %v2603_v46 }
  0xcf   :  { %1522 = vmatprep.subr.bf16.mxu1 %v2600_v45 }
  0xd1   :  { %1486 = vmatpush1.bf16.msra.mxu0 %v2601_v47 }
  0xd2   :  { %1523 = vmatpush1.bf16.msra.mxu1 %v2598_v36  ;;  %1487 = vmatprep.subr.bf16.mxu0 %v2609_v49 }
  0xd3   :  { %1524 = vmatprep.subr.bf16.mxu1 %v2606_v48 }
  0xd5   :  { %1488 = vmatpush2.bf16.msra.mxu0 %v2607_v51  ;;  %v2677_v51 = vld [vmem:[#allocation7 + $0xf8] sm:$0xff]  }
  0xd6   :  { %1525 = vmatpush1.bf16.msra.mxu1 %v2604_v50  ;;  %1489 = vmatprep.subr.bf16.mxu0 %v2615_v54  ;;  %v2679_v54 = vld [vmem:[#allocation7 + $0xf0] sm:$0xff]  }
  0xd7   :  { %1526 = vmatprep.subr.bf16.mxu1 %v2612_v53  ;;  %v2678_v53 = vld [vmem:[#allocation7 + $0xb8] sm:$0xff]  }
  0xd9   :  { %1490 = vmatpush2.bf16.msra.mxu0 %v2613_v56  ;;  %v2681_v56 = vld [vmem:[#allocation7 + $0xe8] sm:$0xff]  }
  0xda   :  { %1527 = vmatpush1.bf16.msra.mxu1 %v2610_v55  ;;  %1491 = vmatprep.subr.bf16.mxu0 %v2621_v58  ;;  %v2680_v55 = vld [vmem:[#allocation7 + $0xb0] sm:$0xff]   ;;  %v2683_v58 = vld [vmem:[#allocation7 + $0xe0] sm:$0xff]  }
  0xdb   :  { %1528 = vmatprep.subr.bf16.mxu1 %v2618_v57  ;;  %v2682_v57 = vld [vmem:[#allocation7 + $0xa8] sm:$0xff]  }
  0xdd   :  { %1492 = vmatpush2.bf16.msra.mxu0 %v2619_v60  ;;  %v2685_v60 = vld [vmem:[#allocation7 + $0xd8] sm:$0xff]  }
  0xde   :  { %1529 = vmatpush2.bf16.msra.mxu1 %v2616_v59  ;;  %1493 = vmatprep.subr.bf16.mxu0 %v2627_v62  ;;  %v2684_v59 = vld [vmem:[#allocation7 + $0xa0] sm:$0xff]   ;;  %v2687_v62 = vld [vmem:[#allocation7 + $0xd0] sm:$0xff]  }
  0xdf   :  { %1530 = vmatprep.subr.bf16.mxu1 %v2624_v61  ;;  %v2686_v61 = vld [vmem:[#allocation7 + $0x98] sm:$0xff]  }
  0xe1   :  { %1494 = vmatpush2.bf16.msra.mxu0 %v2625_v0  ;;  %v2689_v0 = vld [vmem:[#allocation7 + $0xc8] sm:$0xff]  }
  0xe2   :  { %1531 = vmatpush2.bf16.msra.mxu1 %v2622_v63  ;;  %1495 = vmatprep.subr.bf16.mxu0 %v2633_v2  ;;  %v2688_v63 = vld [vmem:[#allocation7 + $0x90] sm:$0xff]  }
  0xe3   :  { %1532 = vmatprep.subr.bf16.mxu1 %v2630_v1  ;;  %v2690_v1 = vld [vmem:[#allocation7 + $0x88] sm:$0xff]  }
  0xe5   :  { %1496 = vmatpush2.bf16.msra.mxu0 %v2631_v4 }
  0xe6   :  { %1533 = vmatpush2.bf16.msra.mxu1 %v2628_v3  ;;  %1497 = vmatprep.subr.bf16.mxu0 %v2639_v6  ;;  %v2691_v3 = vld [vmem:[#allocation7 + $0xc0] sm:$0xff]  }
  0xe7   :  { %1534 = vmatprep.subr.bf16.mxu1 %v2636_v5 }
  0xe9   :  { %1498 = vmatpush2.bf16.msra.mxu0 %v2637_v10 }
  0xea   :  { %1535 = vmatpush2.bf16.msra.mxu1 %v2634_v7  ;;  %1499 = vmatprep.subr.bf16.mxu0 %v2645_v12 }
  0xeb   :  { %1536 = vmatprep.subr.bf16.mxu1 %v2642_v11  ;;  %v2692_v11 = vld [vmem:[#allocation7 + $0x80] sm:$0xff]  }
  0xed   :  { %1500 = vmatpush2.bf16.msra.mxu0 %v2643_v14 }
  0xee   :  { %1537 = vmatpush2.bf16.msra.mxu1 %v2640_v13  ;;  %1501 = vmatprep.subr.bf16.mxu0 %v2651_v17 }
  0xef   :  { %1538 = vmatprep.subr.bf16.mxu1 %v2648_v15 }
  0xf1   :  { %1502 = vmatpush2.bf16.msra.mxu0 %v2649_v21 }
  0xf2   :  { %1539 = vmatpush2.bf16.msra.mxu1 %v2646_v18  ;;  %1567 = vmatprep.subr.bf16.mxu0 %v2657_v23 }
  0xf3   :  { %1540 = vmatprep.subr.bf16.mxu1 %v2654_v22 }
  0xf4   :  { %1504 = vmatmul.mubr.bf16.vlgmr.msra.gmra.mxu0 %v2846_v9  ;;  %v2665_v9 = vld [vmem:[#allocation7 + $0x68] sm:$0xff]  }
  0xf5   :  { %1568 = vmatpush1.bf16.msra.mxu0 %v2655_v25  ;;  %1585 = vmatprep.mubr.bf16.mxu0 %v2795_v16  ;;  %v2668_v16 = vld [vmem:[#allocation7 + $0x20] sm:$0xff]  }
  0xf6   :  { %1541 = vmatpush2.bf16.msra.mxu1 %v2652_v24  ;;  %2314 = vmatprep.subr.bf16.mxu0 %v2661_v28 }
  0xf7   :  { %1542 = vmatprep.subr.bf16.mxu1 %v2660_v26 }
  0xfa   :  { %1543 = vmatpush2.bf16.msra.mxu1 %v2658_v27 }
  0xfb   :  { %2336 = vmatprep.subr.bf16.mxu1 %v2677_v51 }
  0xfc   :  { %2280 = vmatmul.mubr.msk.bf16.vlgmr.msra.gmra.mxu0 %vm1262_vm0, %v2851_v19  ;;  %v2671_v19 = vld [vmem:[#allocation7 + $0x50] sm:$0xff]  }
  0xfd   :  { %1545 = vmatmul.mubr.bf16.vlgmr.msra.gmra.mxu1 %v2859_v20  ;;  %2315 = vmatpush3.bf16.msra.mxu0 %v2662_v29  ;;  %v2669_v20 = vld [vmem:[#allocation7 + $0x58] sm:$0xff]  }
  0xfe   :  { %2316 = vmatprep.subr.bf16.mxu0 %v2663_v30  ;;  %2337 = vmatpush3.bf16.msra.mxu1 %v2678_v53 }
  0xff   :  { %2338 = vmatprep.subr.bf16.mxu1 %v2679_v54  ;;  %v2877_v54 = vld [vmem:[#allocation6] ss:$2 sm:$0xf] }
 0x101   :  { %2317 = vmatpush3.bf16.msra.mxu0 %v2664_v31 }
 0x102   :  { %2318 = vmatprep.subr.bf16.mxu0 %v2665_v9  ;;  %2339 = vmatpush3.bf16.msra.mxu1 %v2680_v55 }
 0x103   :  { %2340 = vmatprep.subr.bf16.mxu1 %v2681_v56  ;;  %v2880_v56 = vld [vmem:[#allocation6 + $0x1] ss:$2 sm:$0xf] }
 0x105   :  { %2319 = vmatpush3.bf16.msra.mxu0 %v2666_v32 }
 0x106   :  { %2320 = vmatprep.subr.bf16.mxu0 %v2667_v33  ;;  %2341 = vmatpush3.bf16.msra.mxu1 %v2682_v57 }
 0x107   :  { %2342 = vmatprep.subr.bf16.mxu1 %v2683_v58 }
 0x109   :  { %2321 = vmatpush3.bf16.msra.mxu0 %v2668_v16 }
 0x10a   :  { %2322 = vmatprep.subr.bf16.mxu0 %v2669_v20  ;;  %2343 = vmatpush3.bf16.msra.mxu1 %v2684_v59 }
 0x10b   :  { %2344 = vmatprep.subr.bf16.mxu1 %v2685_v60 }
 0x10d   :  { %2323 = vmatpush3.bf16.msra.mxu0 %v2670_v34 }
 0x10e   :  { %2324 = vmatprep.subr.bf16.mxu0 %v2671_v19  ;;  %2345 = vmatpush3.bf16.msra.mxu1 %v2686_v61 }
 0x10f   :  { %2346 = vmatprep.subr.bf16.mxu1 %v2687_v62 }
 0x111   :  { %2325 = vmatpush3.bf16.msra.mxu0 %v2672_v35 }
 0x112   :  { %2326 = vmatprep.subr.bf16.mxu0 %v2673_v37  ;;  %2347 = vmatpush3.bf16.msra.mxu1 %v2688_v63 }
 0x113   :  { %2348 = vmatprep.subr.bf16.mxu1 %v2689_v0 }
 0x115   :  { %2327 = vmatpush3.bf16.msra.mxu0 %v2674_v38 }
 0x116   :  { %2328 = vmatprep.subr.bf16.mxu0 %v2675_v52  ;;  %2349 = vmatpush3.bf16.msra.mxu1 %v2690_v1 }
 0x117   :  { %2350 = vmatprep.subr.bf16.mxu1 %v2691_v3 }
 0x119   :  { %2329 = vmatpush3.bf16.msra.mxu0 %v2676_v39 }
 0x11a   :  { %2351 = vmatpush3.bf16.msra.mxu1 %v2692_v11 }
 0x134   :  { %v1300_v40 = vpop.f32.mrf.mxu0 }
 0x135   :  { %v1341_v41 = vpop.f32.mrf.mxu1 }
 0x136   :  { %v1342_v42 = vadd.f32 %v1341_v41, %v1300_v40  ;;  %v1302_v8 = vpop.f32.mrf.mxu0 }
 0x137   :  { %v1343_v43 = vpop.f32.mrf.mxu1 }
 0x138   :  { %v1304_v44 = vpop.f32.mrf.mxu0  ;;  %v1344_v4 = vadd.f32 %v1343_v43, %v1302_v8 }
 0x139   :  { %v1345_v45 = vpop.f32.mrf.mxu1 }
 0x13a   :  { %v1305_v46 = vpop.f32.mrf.mxu0 }
 0x13b   :  { %v1346_v36 = vpop.f32.mrf.mxu1 }
 0x13d   :  { %v1423_v47 = vpop.f32.mrf.mxu1 }
 0x13f   :  { %v1425_v48 = vpop.f32.mrf.mxu1 }
 0x141   :  { %v1427_v49 = vpop.f32.mrf.mxu1 }
 0x143   :  { %v1428_v50 = vpop.f32.mrf.mxu1 }
 0x144   :  { %v1675_v50 = vlaneseq }
 0x146   :  { %v2874_v51 = vshrl.u32 %v1675_v50, 7 }
 0x148   :  { %v1677_v53 = vsub.s32 0, %v2874_v51  ;;  %v1681_v55 = vsub.s32 1, %v2874_v51 }
 0x14a   :  { %v1678_v57 = vrot.slane %v2877_v54, %v1677_v53  ;;  %v1682_v60 = vrot.slane %v2877_v54, %v1681_v55  ;;  %v1703_v61 = vrot.slane %v2880_v56, %v1677_v53  ;;  %v1707_v0 = vrot.slane %v2880_v56, %v1681_v55 }
 0x174   :  { %v1382_v2 = vpop.f32.mrf.mxu0 }
 0x175   :  { %v1383_v5 = vadd.f32 %v1382_v2, %v1342_v42 }
 0x176   :  { %v1384_v6 = vpop.f32.mrf.mxu0 }
 0x177   :  { %v1424_v7 = vadd.f32 %v1423_v47, %v1383_v5  ;;  %v1385_v10 = vadd.f32 %v1384_v6, %v1344_v4 }
 0x178   :  { %v1386_v12 = vpop.f32.mrf.mxu0 }
 0x179   :  { %v1594_v13 = vrot.slane %v1424_v7, 4  ;;  %v1426_v14 = vadd.f32 %v1425_v48, %v1385_v10 }
 0x17a   :  { %v1387_v15 = vpop.f32.mrf.mxu0 }
 0x17b   :  { %v1595_v17 = vadd.f32 %v1594_v13, %v1424_v7  ;;  %v1600_v18 = vrot.slane %v1426_v14, 4 }
 0x17d   :  { %v2870_v21 = vpop.f32.mrf.mxu1  ;;  %v1596_v22 = vrot.slane %v1595_v17, 2  ;;  %v1601_v23 = vadd.f32 %v1600_v18, %v1426_v14 }
 0x17f   :  { %v2872_v24 = vpop.f32.mrf.mxu1  ;;  %v1597_v25 = vadd.f32 %v1596_v22, %v1595_v17  ;;  %v1602_v26 = vrot.slane %v1601_v23, 2 }
 0x181   :  { %v1468_v27 = vpop.f32.mrf.mxu1  ;;  %v1598_v28 = vrot.slane %v1597_v25, 1  ;;  %v1603_v29 = vadd.f32 %v1602_v26, %v1601_v23 }
 0x183   :  { %v1469_v30 = vpop.f32.mrf.mxu1  ;;  %v1599_v31 = vadd.f32 %v1598_v28, %v1597_v25  ;;  %v1604_v9 = vrot.slane %v1603_v29, 1 }
 0x185   :  { %v1619_v32 = vmul.f32 0.125, %v1599_v31  ;;  %v1605_v33 = vadd.f32 %v1604_v9, %v1603_v29 }
 0x187   :  { %v1623_v16 = vsub.f32 %v1424_v7, %v1619_v32  ;;  %v1620_v20 = vmul.f32 0.125, %v1605_v33 }
 0x189   :  { %v1627_v34 = vmul.f32 %v1623_v16, %v1623_v16  ;;  %v1624_v19 = vsub.f32 %v1426_v14, %v1620_v20 }
 0x18b   :  { %v1631_v35 = vrot.slane %v1627_v34, 4  ;;  %v1628_v37 = vmul.f32 %v1624_v19, %v1624_v19 }
 0x18d   :  { %v1632_v38 = vadd.f32 %v1631_v35, %v1627_v34  ;;  %v1637_v52 = vrot.slane %v1628_v37, 4 }
 0x18f   :  { %v1633_v39 = vrot.slane %v1632_v38, 2  ;;  %v1638_v40 = vadd.f32 %v1637_v52, %v1628_v37 }
 0x191   :  { %v1634_v41 = vadd.f32 %v1633_v39, %v1632_v38  ;;  %v1639_v42 = vrot.slane %v1638_v40, 2 }
 0x193   :  { %v1635_v8 = vrot.slane %v1634_v41, 1  ;;  %v1640_v43 = vadd.f32 %v1639_v42, %v1638_v40 }
 0x195   :  { %v1636_v44 = vadd.f32 %v1635_v8, %v1634_v41  ;;  %v1641_v45 = vrot.slane %v1640_v43, 1 }
 0x197   :  { %v1655_v46 = vmul.f32 0.125, %v1636_v44  ;;  %v1642_v36 = vadd.f32 %v1641_v45, %v1640_v43 }
 0x199   :  { %v1662_v47 = vadd.f32 1e-05, %v1655_v46  ;;  %v1656_v48 = vmul.f32 0.125, %v1642_v36 }
 0x19b   :  { %2693 = vrsqrt.f32 %v1662_v47  ;;  %v1663_v49 = vadd.f32 1e-05, %v1656_v48 }
 0x19d   :  { %2695 = vrsqrt.f32 %v1663_v49 }
 0x1a8   :  { %v2694_v58 = vpop.eup %2693 }
 0x1a9   :  { %v1670_v59 = vmul.f32 %v2694_v58, %v1623_v16 }
 0x1aa   :  { %v2696_v62 = vpop.eup %2695 }
 0x1ab   :  { %v1671_v63 = vmul.f32 %v2696_v62, %v1624_v19  ;;  %v1695_v1 = vmul.f32 %v1678_v57, %v1670_v59 }
 0x1ad   :  { %v1696_v2 = vmul.f32 %v1682_v60, %v1671_v63  ;;  %v1720_v3 = vadd.f32 %v1703_v61, %v1695_v1  ;;  %v1689_v1 = vsub.s32 3, %v2874_v51 }
 0x1af   :  { %v1721_v4 = vadd.f32 %v1707_v0, %v1696_v2  ;;  %v1724_v5 = vmax.f32 %v1720_v3, 0.0  ;;  %v1685_v0 = vsub.s32 2, %v2874_v51 }
 0x1b1   :  { %v1725_v6 = vmax.f32 %v1721_v4, 0.0  ;;  %v1728_v11 = vpack.c.bf16 %v1724_v5, %v1724_v5  ;;  %v1686_v2 = vrot.slane %v2877_v54, %v1685_v0  ;;  %v1690_v5 = vrot.slane %v2877_v54, %v1689_v1 }
 0x1b3   :  { %v1729_v7 = vpack.c.bf16 %v1725_v6, %v1725_v6  ;;  %v1711_v6 = vrot.slane %v2880_v56, %v1685_v0 }
 0x1b4   :  { %v1505_v10 = vpop.f32.mrf.mxu0 }
 0x1b5   :  { %2027 = vmatprep.mubr.bf16.mxu0 %v1729_v7  ;;  %v1506_v15 = vadd.f32 %v1505_v10, %v2870_v21 }
 0x1b6   :  { %v1507_v12 = vpop.f32.mrf.mxu0  ;;  %2028 = vmatmul.mubr.bf16.vlgmr.msra.gmra.mxu0 %v1728_v11 }
 0x1b7   :  { %v1508_v22 = vadd.f32 %v1507_v12, %v2872_v24  ;;  %v1715_v12 = vrot.slane %v2880_v56, %v1689_v1 }
 0x1b8   :  { %v1509_v13 = vpop.f32.mrf.mxu0 }
 0x1ba   :  { %v1510_v14 = vpop.f32.mrf.mxu0 }
 0x1bc   :  { %v1587_v18 = vpop.f32.mrf.mxu0 }
 0x1bd   :  { %v1546_v17 = vpop.f32.mrf.mxu1 }
 0x1be   :  { %v1547_v23 = vadd.f32 %v1546_v17, %v1506_v15  ;;  %v1589_v26 = vpop.f32.mrf.mxu0 }
 0x1bf   :  { %v1548_v25 = vpop.f32.mrf.mxu1 }
 0x1c0   :  { %v1588_v27 = vadd.f32 %v1587_v18, %v1547_v23  ;;  %v1549_v28 = vadd.f32 %v1548_v25, %v1508_v22  ;;  %v1591_v30 = vpop.f32.mrf.mxu0 }
 0x1c1   :  { %v1550_v29 = vpop.f32.mrf.mxu1 }
 0x1c2   :  { %v1606_v31 = vrot.slane %v1588_v27, 4  ;;  %v1590_v9 = vadd.f32 %v1589_v26, %v1549_v28  ;;  %v1592_v33 = vpop.f32.mrf.mxu0  ;;  %v2281_v28 = vld [vmem:[%s2904_s4] ss:$0 sm:$0xff] }
 0x1c3   :  { %v1551_v32 = vpop.f32.mrf.mxu1 }
 0x1c4   :  { %v1607_v16 = vadd.f32 %v1606_v31, %v1588_v27  ;;  %v1612_v20 = vrot.slane %v1590_v9, 4 }
 0x1c6   :  { %v1608_v34 = vrot.slane %v1607_v16, 2  ;;  %v1613_v19 = vadd.f32 %v1612_v20, %v1590_v9 }
 0x1c8   :  { %v1609_v21 = vadd.f32 %v1608_v34, %v1607_v16  ;;  %v1614_v35 = vrot.slane %v1613_v19, 2 }
 0x1ca   :  { %v1610_v37 = vrot.slane %v1609_v21, 1  ;;  %v1615_v38 = vadd.f32 %v1614_v35, %v1613_v19 }
 0x1cc   :  { %v1611_v24 = vadd.f32 %v1610_v37, %v1609_v21  ;;  %v1616_v52 = vrot.slane %v1615_v38, 1 }
 0x1ce   :  { %v1621_v39 = vmul.f32 0.125, %v1611_v24  ;;  %v1617_v40 = vadd.f32 %v1616_v52, %v1615_v38 }
 0x1d0   :  { %v1625_v41 = vsub.f32 %v1588_v27, %v1621_v39  ;;  %v1622_v42 = vmul.f32 0.125, %v1617_v40 }
 0x1d2   :  { %v1629_v8 = vmul.f32 %v1625_v41, %v1625_v41  ;;  %v1626_v43 = vsub.f32 %v1590_v9, %v1622_v42 }
 0x1d4   :  { %v1643_v44 = vrot.slane %v1629_v8, 4  ;;  %v1630_v45 = vmul.f32 %v1626_v43, %v1626_v43 }
 0x1d6   :  { %v1644_v46 = vadd.f32 %v1643_v44, %v1629_v8  ;;  %v1649_v36 = vrot.slane %v1630_v45, 4 }
 0x1d8   :  { %v1645_v47 = vrot.slane %v1644_v46, 2  ;;  %v1650_v48 = vadd.f32 %v1649_v36, %v1630_v45 }
 0x1da   :  { %v1646_v49 = vadd.f32 %v1645_v47, %v1644_v46  ;;  %v1651_v50 = vrot.slane %v1650_v48, 2 }
 0x1dc   :  { %v1647_v53 = vrot.slane %v1646_v49, 1  ;;  %v1652_v55 = vadd.f32 %v1651_v50, %v1650_v48 }
 0x1de   :  { %v1648_v57 = vadd.f32 %v1647_v53, %v1646_v49  ;;  %v1653_v58 = vrot.slane %v1652_v55, 1 }
 0x1e0   :  { %v1657_v59 = vmul.f32 0.125, %v1648_v57  ;;  %v1654_v60 = vadd.f32 %v1653_v58, %v1652_v55 }
 0x1e2   :  { %v1664_v61 = vadd.f32 1e-05, %v1657_v59  ;;  %v1658_v62 = vmul.f32 0.125, %v1654_v60 }
 0x1e4   :  { %2697 = vrsqrt.f32 %v1664_v61  ;;  %v1665_v63 = vadd.f32 1e-05, %v1658_v62 }
 0x1e6   :  { %2699 = vrsqrt.f32 %v1665_v63 }
 0x1f1   :  { %v2698_v3 = vpop.eup %2697 }
 0x1f2   :  { %v1672_v4 = vmul.f32 %v2698_v3, %v1625_v41 }
 0x1f3   :  { %v2700_v7 = vpop.eup %2699 }
 0x1f4   :  { %v1697_v10 = vmul.f32 %v1686_v2, %v1672_v4  ;;  %v1673_v11 = vmul.f32 %v2700_v7, %v1626_v43 }
 0x1f6   :  { %v1698_v13 = vmul.f32 %v1690_v5, %v1673_v11  ;;  %v1722_v14 = vadd.f32 %v1711_v6, %v1697_v10 }
 0x1f8   :  { %v1723_v15 = vadd.f32 %v1715_v12, %v1698_v13  ;;  %v1726_v17 = vmax.f32 %v1722_v14, 0.0 }
 0x1fa   :  { %v1727_v18 = vmax.f32 %v1723_v15, 0.0  ;;  %v1730_v51 = vpack.c.bf16 %v1726_v17, %v1726_v17 }
 0x1fc   :  { %v1731_v22 = vpack.c.bf16 %v1727_v18, %v1727_v18 }
 0x1fe   :  { %2067 = vmatprep.mubr.bf16.mxu1 %v1731_v22 }
 0x1ff   :  { %2068 = vmatmul.mubr.bf16.vlgmr.msra.gmra.mxu1 %v1730_v51 }
 0x276   :  { %v2330_v23 = vpop.f32.mrf.mxu0 }
 0x278   :  { %v2331_v25 = vpop.f32.mrf.mxu0 }
 0x279   :  { %v2332_v26 = vadd.f32 %v2331_v25, %v2330_v23 }
 0x27a   :  { %v2333_v54 = vpop.f32.mrf.mxu0 }
 0x27b   :  { %v2030_v30 = vadd.f32 %v2332_v26, %v2281_v28 }
 0x27c   :  { %v2334_v27 = vpop.f32.mrf.mxu0 }
 0x2bf   :  { %v2352_v29 = vpop.f32.mrf.mxu1 }
 0x2c1   :  { %v2353_v56 = vpop.f32.mrf.mxu1 }
 0x2c2   :  { %v2354_v31 = vadd.f32 %v2353_v56, %v2352_v29 }
 0x2c3   :  { %v2355_v9 = vpop.f32.mrf.mxu1 }
 0x2c4   :  { %v2070_v32 = vadd.f32 %v2354_v31, %v2030_v30 }
 0x2c5   :  { %v2356_v33 = vpop.f32.mrf.mxu1 }
 0x2c6   :  { %2075 = vst [vmem:[%s2905_s5] sm:$0xff] %v2070_v32 }
 0x2c7   :  { %2080 = vsyncpa [#allocation3], 1 }
 0x2c8   :  { %2081 = vsyncpa [#allocation5], 1 }
 0x2c9   :  { %2082 = vsyncpa [#allocation8], 1 }

</bundles_post_ra>
